<compile_context>
chip_gen: v7x
topology: tpu7x:2x2x1
jax: 0.10.0
libtpu: 0.0.40
codegen_flags: <defaults>
</compile_context>

<pallas_src>
import functools

import jax
import jax.numpy as jnp
from jax.experimental import pallas as pl
from jax.experimental.pallas import tpu as pltpu


def _layernorm_kernel(x_ref, a_ref, b_ref, o_ref, *, eps: float, features: int):
    # x_ref: (tile_rows, F);  a_ref / b_ref: (1, F) already in the compute dtype.
    # Rows are independent: the ragged last grid block (garbage padding rows,
    # masked partial stores) cannot poison valid rows.
    x = x_ref[...]
    xf = x.astype(jnp.float32)

    inv_f = jnp.float32(1.0 / features)
    mean = jnp.sum(xf, axis=-1, keepdims=True) * inv_f

    # Two-pass centered variance (numerically robust; x is VMEM-resident so no
    # extra HBM traffic).  torch.std default is the unbiased estimator (ddof=1).
    # TODO(synk): F == 1 gives std = 0 here, whereas torch.std(ddof=1) is NaN.
    centered = xf - mean
    ddof_scale = jnp.float32(1.0 / max(features - 1, 1))
    var = jnp.sum(centered * centered, axis=-1, keepdims=True) * ddof_scale
    std = jnp.sqrt(var)

    # eps is added to STD (not to var before sqrt) to match the PyTorch module.
    # approx=False: the approximate EUP reciprocal is too coarse for ~1e-5 rtol.
    inv_std = pl.reciprocal(std + jnp.float32(eps), approx=False)

    if jnp.dtype(a_ref.dtype) == jnp.dtype(jnp.bfloat16):
        # bf16 epilogue for bf16 I/O: the big elementwise scale/shift runs in
        # packed bf16 (2x elems/vreg on v6e/v7x VALUs) while moments stay f32,
        # keeping v7x on the HBM roofline instead of going VPU-bound.
        y = centered.astype(jnp.bfloat16) * inv_std.astype(jnp.bfloat16)
        o_ref[...] = (y * a_ref[...] + b_ref[...]).astype(o_ref.dtype)
    else:
        o_ref[...] = (centered * inv_std * a_ref[...] + b_ref[...]).astype(o_ref.dtype)


def _round_up(v: int, m: int) -> int:
    return ((v + m - 1) // m) * m


def _vmem_capacity_bytes() -> int:
    try:
        return int(pltpu.get_tpu_info().vmem_capacity_bytes)
    except Exception:
        return 64 << 20  # conservative: assume the smallest per-TC VMEM (v7x)


def _choose_tile_rows(n_rows: int, f: int, itemsize: int) -> int:
    # Native sublane multiple for the I/O dtype: 8 (f32), 16 (bf16), 32 (int8).
    sublane = max(8, 32 // max(itemsize, 1))

    vmem_cap = _vmem_capacity_bytes()
    # Gen-gated working-set budget: exploit 128 MiB VMEM on v5e/v6e, stay well
    # under the 64 MiB physical VMEM on v7x.
    budget = (80 << 20) if vmem_cap >= (128 << 20) else (40 << 20)

    # Honest per-row bytes in flight:
    #   pipeline: double-buffered input + double-buffered output = 4*F*itemsize
    #   in-kernel whole-tile f32 temporaries (x_f32, centered, products) ~ 4*F*4
    per_row = 4 * f * itemsize + 4 * f * 4

    tile = budget // max(per_row, 1)
    tile = min(tile, 1024)  # diminishing returns past ~1K rows (~85% of roofline)
    # Keep at least ~4 grid blocks so ("parallel",) can shard the grid across
    # both TensorCores on v7x and the ragged tail is amortized.
    tile = min(tile, _round_up(-(-n_rows // 4), sublane))
    tile = max(sublane, (tile // sublane) * sublane)
    return int(tile)


def layernorm_ref(x, a_2, b_2, eps=1e-6):
    # Pure-JAX reference mirroring the PyTorch module (eps on std, ddof=1).
    xf = x.astype(jnp.float32)
    mean = jnp.mean(xf, axis=-1, keepdims=True)
    std = jnp.std(xf, axis=-1, keepdims=True, ddof=1)
    return (a_2.astype(jnp.float32) * (xf - mean) / (std + eps)
            + b_2.astype(jnp.float32)).astype(x.dtype)


def layernorm(x, a_2, b_2, eps=1e-6, tile_rows=None, use_pallas=None):
    """x: (..., F);  a_2, b_2: (F,).  Normalizes over the last axis."""
    orig_shape = x.shape
    f = orig_shape[-1]

    # F < 128 would leave most of every 128-wide lane group masked (vst.msk
    # partial stores); plain XLA is a better fit for such narrow features.
    if use_pallas is None:
        use_pallas = f >= 128
    if not use_pallas:
        return layernorm_ref(x, a_2, b_2, eps)

    x2 = x.reshape(-1, f)
    n = x2.shape[0]
    itemsize = jnp.dtype(x.dtype).itemsize
    if tile_rows is None:
        tile_rows = _choose_tile_rows(n, f, itemsize)

    # Pre-cast params in the wrapper: no per-grid-step astype inside the kernel.
    compute_dtype = (jnp.bfloat16
                     if jnp.dtype(x.dtype) == jnp.dtype(jnp.bfloat16)
                     else jnp.float32)
    a2 = a_2.reshape(1, f).astype(compute_dtype)
    b2 = b_2.reshape(1, f).astype(compute_dtype)

    kernel = functools.partial(_layernorm_kernel, eps=float(eps), features=int(f))

    vmem_cap = _vmem_capacity_bytes()
    vmem_limit = (96 << 20) if vmem_cap >= (128 << 20) else (48 << 20)

    out = pl.pallas_call(
        kernel,
        out_shape=jax.ShapeDtypeStruct((n, f), x.dtype),
        grid_spec=pltpu.PrefetchScalarGridSpec(
            num_scalar_prefetch=0,
            grid=(pl.cdiv(n, tile_rows),),
            in_specs=[
                pl.BlockSpec((tile_rows, f), lambda i: (i, 0)),
                pl.BlockSpec((1, f), lambda i: (0, 0)),
                pl.BlockSpec((1, f), lambda i: (0, 0)),
            ],
            out_specs=pl.BlockSpec((tile_rows, f), lambda i: (i, 0)),
        ),
        compiler_params=pltpu.CompilerParams(
            dimension_semantics=("parallel",),   # megacore shard on v7x
            vmem_limit_bytes=vmem_limit,
        ),
    )(x2, a2, b2)

    return out.reshape(orig_shape)


if __name__ == "__main__":
    key = jax.random.PRNGKey(0)
    # Small but lane-dense shape (F multiple of 128) so the Pallas path runs.
    batch, seq, features = 2, 8, 128
    x = jax.random.normal(key, (batch, seq, features), dtype=jnp.float32)

    # Deterministic parameter init, matching nn.Parameter(ones/zeros(features)).
    a_2 = jnp.ones((features,), dtype=jnp.float32)
    b_2 = jnp.zeros((features,), dtype=jnp.float32)

    out = jax.block_until_ready(layernorm(x, a_2, b_2, eps=1e-6))

    ref = layernorm_ref(x, a_2, b_2, eps=1e-6)
    assert out.shape == x.shape
    assert jnp.allclose(out, ref, atol=1e-5, rtol=1e-4), "mismatch vs reference"

    print("KERNEL_OK")
</pallas_src>

<mosaic_0001>
module attributes {stable_mosaic.version = 11 : i64} {
  func.func @_layernorm_kernel(%arg0: i32, %arg1: memref<8x128xf32, #tpu.memory_space<vmem>>, %arg2: memref<1x128xf32, #tpu.memory_space<vmem>>, %arg3: memref<1x128xf32, #tpu.memory_space<vmem>>, %arg4: memref<8x128xf32, #tpu.memory_space<vmem>>) attributes {dimension_semantics = [#tpu.dimension_semantics<parallel>], iteration_bounds = array<i64: 2>, scalar_prefetch = 0 : i64, scratch_operands = 0 : i64, tpu.core_type = #tpu.core_type<tc>, window_params = [{transform_indices = @transform_0, window_bounds = array<i64: 8, 128>}, {pipeline_mode = #tpu.pipeline_mode<synchronous>, transform_indices = @transform_1, window_bounds = array<i64: 1, 128>}, {pipeline_mode = #tpu.pipeline_mode<synchronous>, transform_indices = @transform_2, window_bounds = array<i64: 1, 128>}, {transform_indices = @transform_3, window_bounds = array<i64: 8, 128>}]} {
    %c0 = arith.constant 0 : index
    %c0_0 = arith.constant 0 : index
    %0 = vector.load %arg1[%c0, %c0_0] : memref<8x128xf32, #tpu.memory_space<vmem>>, vector<8x128xf32>
    %cst = arith.constant dense<0.000000e+00> : vector<8xf32>
    %1 = vector.multi_reduction <add>, %0, %cst [1] : vector<8x128xf32> to vector<8xf32>
    %2 = vector.shape_cast %1 : vector<8xf32> to vector<8x1xf32>
    %cst_1 = arith.constant 7.812500e-03 : f32
    %3 = vector.broadcast %cst_1 : f32 to vector<8x1xf32>
    %4 = arith.mulf %2, %3 : vector<8x1xf32>
    %5 = vector.broadcast %4 : vector<8x1xf32> to vector<8x128xf32>
    %6 = arith.subf %0, %5 : vector<8x128xf32>
    %7 = arith.mulf %6, %6 : vector<8x128xf32>
    %cst_2 = arith.constant dense<0.000000e+00> : vector<8xf32>
    %8 = vector.multi_reduction <add>, %7, %cst_2 [1] : vector<8x128xf32> to vector<8xf32>
    %9 = vector.shape_cast %8 : vector<8xf32> to vector<8x1xf32>
    %cst_3 = arith.constant 0.00787401571 : f32
    %10 = vector.broadcast %cst_3 : f32 to vector<8x1xf32>
    %11 = arith.mulf %9, %10 : vector<8x1xf32>
    %12 = math.sqrt %11 : vector<8x1xf32>
    %cst_4 = arith.constant 9.99999997E-7 : f32
    %13 = vector.broadcast %cst_4 : f32 to vector<8x1xf32>
    %14 = arith.addf %12, %13 : vector<8x1xf32>
    %15 = tpu.reciprocal %14 : vector<8x1xf32> -> vector<8x1xf32>
    %16 = vector.broadcast %15 : vector<8x1xf32> to vector<8x128xf32>
    %17 = arith.mulf %6, %16 : vector<8x128xf32>
    %c0_5 = arith.constant 0 : index
    %c0_6 = arith.constant 0 : index
    %18 = vector.load %arg2[%c0_5, %c0_6] : memref<1x128xf32, #tpu.memory_space<vmem>>, vector<1x128xf32>
    %19 = vector.broadcast %18 : vector<1x128xf32> to vector<8x128xf32>
    %20 = arith.mulf %17, %19 : vector<8x128xf32>
    %c0_7 = arith.constant 0 : index
    %c0_8 = arith.constant 0 : index
    %21 = vector.load %arg3[%c0_7, %c0_8] : memref<1x128xf32, #tpu.memory_space<vmem>>, vector<1x128xf32>
    %22 = vector.broadcast %21 : vector<1x128xf32> to vector<8x128xf32>
    %23 = arith.addf %20, %22 : vector<8x128xf32>
    %c0_9 = arith.constant 0 : index
    %c0_10 = arith.constant 0 : index
    %24 = vector.load %arg4[%c0_9, %c0_10] : memref<8x128xf32, #tpu.memory_space<vmem>>, vector<8x128xf32>
    tpu.vector_store %arg4[%c0_9, %c0_10], %23 {strides = array<i32>} : memref<8x128xf32, #tpu.memory_space<vmem>>, vector<8x128xf32>,
    return
  }
  func.func @transform_0(%arg0: i32) -> (i32, i32) {
    %c0_i32 = arith.constant 0 : i32
    %c0_i32_0 = arith.constant 0 : i32
    return %arg0, %c0_i32 : i32, i32
  }
  func.func @transform_1(%arg0: i32) -> (i32, i32) {
    %c0_i32 = arith.constant 0 : i32
    %c0_i32_0 = arith.constant 0 : i32
    %c0_i32_1 = arith.constant 0 : i32
    return %c0_i32, %c0_i32_0 : i32, i32
  }
  func.func @transform_2(%arg0: i32) -> (i32, i32) {
    %c0_i32 = arith.constant 0 : i32
    %c0_i32_0 = arith.constant 0 : i32
    %c0_i32_1 = arith.constant 0 : i32
    return %c0_i32, %c0_i32_0 : i32, i32
  }
  func.func @transform_3(%arg0: i32) -> (i32, i32) {
    %c0_i32 = arith.constant 0 : i32
    %c0_i32_0 = arith.constant 0 : i32
    return %arg0, %c0_i32 : i32, i32
  }
}

</mosaic_0001>

<bundles_post_ra>
// kernel: tpu_custom_call.1
= control target key start
LH: loop header
LB: loop body
LE: loop exit
PB: predicated region body
PF: predicated region fallthrough
CT: control target
= control target key end

     0   :  { %8 = vsyncpa [#allocation3], 0  ;;  %s657_s0 = inlined_call_operand.hbm [shape: f32[16,128], index: 0, kind: input, shape index: {}]   ;;  %s658_s1 = inlined_call_operand.vmem [shape: f32[1,128], index: 1, kind: input, shape index: {}]   ;;  %s659_s2 = inlined_call_operand.vmem [shape: f32[1,128], index: 2, kind: input, shape index: {}]   ;;  %s660_s3 = inlined_call_operand.hbm [shape: f32[16,128], index: 3, kind: output, shape index: {}]  }
   0x1   :  { %10 = vsyncpa [#allocation3 + $0x1], 0 }
   0x2   :  { %11 = vsyncpa [#allocation4], 0 }
   0x3   :  { %13 = vsyncpa [#allocation4 + $0x1], 0  ;;  %s490_s12 = smov 0   ;;  %s492_s13 = smov 0  }
   0x4   :  { %s494_s14 = smov 0   ;;  %s496_s15 = smov 0  }
   0x5 LB: > { %s511_s16 = sadd.s32 4294967295, %s466_s15   ;;  %s306_s17 = sadd.s32 4294967294, %s466_s15   ;;  %s466_s15 = sphi %s496_s15, %s675_s15   ;;  %s462_s14 = sphi %s494_s14, %s674_s14   ;;  %s458_s13 = sphi %s492_s13, %s673_s13   ;;  %s454_s12 = sphi %s490_s12, %s672_s12  }
   0x6   : > { %s515_s18 = sadd.s32 1, %s466_s15   ;;  %s26_s19 = sadd.s32 1, %s462_s14 }
   0x7   : > { %s23_s20 = ssub.s32 %s466_s15, %s515_s18  ;;  %p33_p0 = scmp.ne.s32.totalorder %s462_s14, %s458_s13 }
   0x8   : > { %p24_p1 = scmp.eq.s32.totalorder %s23_s20, 0  ;;  %p34_p2 = scmp.eq.s32.totalorder %s466_s15, 0 }
   0x9   : > { %p39_p3 = scmp.ne.s32.totalorder %s458_s13, %s454_s12  ;;  %p40_p4 = scmp.eq.s32.totalorder %s511_s16, 0 }
   0xa   : > { %s527_s21 = scalar_select %p24_p1, %s462_s14, %s26_s19  }
   0xb   : > { %p529_p5 = por %p34_p2, %p33_p0  ;;  %p533_p6 = por %p40_p4, %p39_p3 }
   0xc   : > { %p105_p7 = scmp.eq.s32.totalorder %s511_s16, 1  ;;  %p111_p8 = scmp.eq.s32.totalorder %s306_s17, 1 }
   0xd   : > { %p332_p10 = scmp.lt.s32.totalorder %s466_s15, 2  ;;  %s137_s26 = sand.u32 1, %s462_s14  }
   0xe   : > { %p540_p11 = por %p105_p7, %p33_p0  ;;  %p544_p12 = por %p111_p8, %p39_p3 }
   0xf   : > { %s310_s27 = sshll.u32 %s466_s15, 7  ;;  %s309_s28 = sshll.u32 %s137_s26, 3 }
  0x10   : > { %s664_s24 = scalar_select %p540_p11, 1, 0 }
  0x11   : > { %s665_s25 = scalar_select %p544_p12, 1, 0 }
  0x12   : > { %s553_s4 = scalar_lea.hbm %s657_s0, %s310_s27  ;;  %s141_s5 = scalar_lea.vmem [#allocation2], %s309_s28 }
  0x13   : > { %s148_s6 = sshll.u32 %s141_s5, 4  ;;  %p557_p13 = pnand %p332_p10, %p529_p5  ;;  %s561_s6 = int_to_ptr.vmem [resolvable:$true] %s148_s6 }
  0x14   : > { %s138_s8 = scalar_lea.sflag [#allocation3], %s137_s26  ;;  %s370_s9 = scalar_lea.hbm %s553_s4, 128 }
  0x15   : > { %p371_p2 = scmp.ne.s32.totalorder %s553_s4, %s370_s9  ;;  %p372_p3 = pneg %p557_p13 }
  0x16   : > { %s375_s17 = scalar_lea.hbm %s657_s0, 256  ;;  %p376_p5 = scmp.lt.u32.totalorder %s553_s4, %s657_s0 }
  0x17   : > { %p373_p4 = pnand %p372_p3, %p371_p2  ;;  %p377_p8 = scmp.lt.u32.totalorder %s375_s17, %s370_s9 }
  0x18   : > { %p379_p9 = scmp.lt.u32.totalorder %s370_s9, %s553_s4 }
  0x19   : > { %p374_p7 = pneg %p373_p4  ;;  %p378_p10 = por %p377_p8, %p376_p5 }
  0x1b   : > { %p380_p0 = por %p379_p9, %p378_p10 }
  0x1d   : > { %p381_p1 = pnand %p380_p0, %p374_p7 }
  0x1f   : > { %384 = shalt.err (!%p381_p1)
}
  0x20   : > { %s385_s22 = scalar_lea.vmem %s561_s6, 128  ;;  %s468_s26 = smov [#allocation2]  }
  0x21   : > { %p386_p2 = scmp.ne.s32.totalorder %s561_s6, %s385_s22  ;;  %s390_s27 = sshll.u32 %s468_s26, 4  ;;  %s391_s27 = int_to_ptr.vmem [resolvable:$false] %s390_s27 }
  0x22   : > { %s392_s28 = scalar_lea.vmem %s391_s27, 256  ;;  %p393_p11 = scmp.lt.s32.totalorder %s561_s6, %s391_s27 }
  0x23   : > { %p388_p4 = pnand %p386_p2, %p372_p3  ;;  %p394_p5 = scmp.lt.s32.totalorder %s392_s28, %s385_s22 }
  0x25   : > { %p389_p12 = pneg %p388_p4  ;;  %p395_p8 = por %p394_p5, %p393_p11 }
  0x27   : > { %p396_p9 = pnand %p395_p8, %p389_p12 }
  0x29   : > { %399 = shalt.err (!%p396_p9)
}
  0x2a   : > { %327 = dma.hbm_to_vmem [thread:$0]  (!%p557_p13), %s553_s4, 128, %s561_s6, %s138_s8  }
  0x2b   : > { %p667_p0 = scmp.lt.s32.totalorder %s466_s15, 3  ;;  %p668_p1 = scmp.ge.s32.totalorder %s466_s15, 1 }
  0x2d   : > { %p154_p3 = pnand %p668_p1, %p667_p0 }
  0x2e   : > { %s595_s29 = sand.u32 (!%p154_p3), 1, %s458_s13  }
  0x2f   : > { %157 = sbr.rel (%p154_p3) target bundleno = 396 (0x18c), region = 32  ;;  %s312_s30 = sshll.u32 (!%p154_p3), %s595_s29, 3 }
  0x30   : > { %s160_s5 = scalar_lea.sflag (!%p154_p3), [#allocation3], %s595_s29  ;;  %s163_s9 = scalar_lea.vmem (!%p154_p3), [#allocation2], %s312_s30 }
  0x36   : > { %445 = dma.done.wait (%p533_p6), %s160_s5, 128  }
  0x37   : > { %447 = vsyncadd (%p533_p6), %s160_s5, 4294967168  ;;  %v186_v0 = vld [vmem:[%s163_s9] sm:$0xff]  ;;  %s317_s8 = sshll.u32 %s511_s16, 7  ;;  %s185_s10 = scalar_lea.vmem [#allocation5], %s312_s30 }
  0x38   : > { %187 = vadd.xlane.f32.xlu0 %v186_v0  ;;  %v314_v14 = vld [vmem:[%s658_s1] ss:$0 sm:$0xff]  ;;  %s236_s11 = sshll.u32 %s185_s10, 4  ;;  %s613_s20 = scalar_lea.hbm %s660_s3, %s317_s8  ;;  %s615_s11 = int_to_ptr.vmem [resolvable:$true] %s236_s11 }
  0x39   : > { %v315_v16 = vld [vmem:[%s659_s2] ss:$0 sm:$0xff]  ;;  %s223_s22 = scalar_lea.sflag [#allocation4], %s595_s29  ;;  %s400_s26 = scalar_lea.vmem %s615_s11, 128 }
  0x3a   : > { %p401_p6 = scmp.ne.s32.totalorder %s615_s11, %s400_s26  ;;  %p669_p11 = scmp.ne.s32.totalorder %s664_s24, 0 }
  0x3b   : > { %s469_s16 = smov [#allocation5]  }
  0x3c   : > { %p402_p12 = pnand %p401_p6, %p669_p11  ;;  %s404_s27 = sshll.u32 %s469_s16, 4  ;;  %s405_s27 = int_to_ptr.vmem [resolvable:$false] %s404_s27 }
  0x3d   : > { %s406_s28 = scalar_lea.vmem %s405_s27, 256  ;;  %p407_p7 = scmp.lt.s32.totalorder %s615_s11, %s405_s27 }
  0x3e   : > { %p403_p13 = pneg %p402_p12  ;;  %p408_p10 = scmp.lt.s32.totalorder %s406_s28, %s400_s26 }
  0x40   : > { %p409_p2 = por %p408_p10, %p407_p7 }
  0x42   : > { %p410_p4 = pnand %p409_p2, %p403_p13 }
  0xc5   : > { %v188_v1 = vpop.xlane.xlu0 %187 }
  0xc6   : > { %v189_v2 = vmul.f32 0.0078125, %v188_v1 }
  0xc8   : > { %v190_v3 = vsub.f32 %v186_v0, %v189_v2 }
  0xca   : > { %v191_v4 = vmul.f32 %v190_v3, %v190_v3 }
  0xcc   : > { %192 = vadd.xlane.f32.xlu0 %v191_v4 }
 0x159   : > { %v193_v5 = vpop.xlane.xlu0 %192 }
 0x15a   : > { %v194_v6 = vmul.f32 0.007874016, %v193_v5 }
 0x15c   : > { %366 = vrsqrt.f32 %v194_v6  ;;  %vm197_vm0 = vcmp.eq.f32.partialorder %v194_v6, inf  ;;  %v200_v9 = vand.u32 2147483648, %v194_v6  ;;  %vm199_vm1 = vcmp.eq.f32.partialorder %v194_v6, 0.0 }
 0x166   : > { %v367_v7 = vpop.eup %366 }
 0x167   : > { %v196_v8 = vmul.f32 %v367_v7, %v194_v6 }
 0x169   : > { %v198_v10 = vsel %vm197_vm0, %v194_v6, %v196_v8 }
 0x16a   : > { %v201_v11 = vsel %vm199_vm1, %v200_v9, %v198_v10 }
 0x16b   : > { %v202_v12 = vadd.f32 1e-06, %v201_v11 }
 0x16d   : > { %368 = vrcp.f32 %v202_v12 }
 0x177   : > { %v369_v13 = vpop.eup %368 }
 0x178   : > { %v204_v15 = vmul.f32 %v369_v13, %v190_v3 }
 0x17a   : > { %v212_v17 = vmul.f32 %v314_v14, %v204_v15 }
 0x17c   : > { %v220_v18 = vadd.f32 %v315_v16, %v212_v17 }
 0x17e   : > { %221 = vst [vmem:[%s185_s10] sm:$0xff] %v220_v18 }
 0x17f   : > { %413 = shalt.err (!%p410_p4)
}
 0x180   : > { %s414_s29 = scalar_lea.hbm %s613_s20, 128  ;;  %s418_s9 = scalar_lea.hbm %s660_s3, 256 }
 0x181   : > { %p415_p5 = scmp.ne.s32.totalorder %s613_s20, %s414_s29  ;;  %p419_p0 = scmp.lt.u32.totalorder %s613_s20, %s660_s3 }
 0x182   : > { %p420_p1 = scmp.lt.u32.totalorder %s418_s9, %s414_s29  ;;  %p422_p6 = scmp.lt.u32.totalorder %s414_s29, %s613_s20 }
 0x183   : > { %p416_p8 = pnand %p415_p5, %p669_p11 }
 0x184   : > { %p421_p3 = por %p420_p1, %p419_p0 }
 0x185   : > { %p417_p9 = pneg %p416_p8 }
 0x186   : > { %p423_p12 = por %p422_p6, %p421_p3 }
 0x188   : > { %p424_p13 = pnand %p423_p12, %p417_p9 }
 0x18a   : > { %427 = shalt.err (!%p424_p13)
}
 0x18b   : > { %322 = dma.vmem_to_hbm [thread:$0]  (%p669_p11), %s615_s11, 128, %s613_s20, %s223_s22  }
 0x18c PF: > { %s248_s6 = sand.u32 1, %s454_s12   ;;  %p670_p7 = scmp.ne.s32.totalorder %s665_s25, 0 }
 0x18d   : > { %p671_p10 = scmp.ge.s32.totalorder %s466_s15, 2  ;;  %s249_s7 = scalar_lea.sflag [#allocation4], %s248_s6 }
 0x18f   : > { %p329_p2 = pnand %p671_p10, %p670_p7 }
 0x191   : > { %449 = dma.done.wait (!%p329_p2), %s249_s7, 128  }
 0x192   : > { %451 = vsyncadd (!%p329_p2), %s249_s7, 4294967168  ;;  %p16_p4 = scmp.ge.s32.totalorder %s515_s18, 4   ;;  %s672_s12 = smov %s458_s13 }
 0x193   : > { %s673_s13 = smov %s462_s14  ;;  %s674_s14 = smov %s527_s21 }
 0x194   : > { %s675_s15 = smov %s515_s18  ;;  %18 = sbr.rel (!%p16_p4) target bundleno = 5 (0x5), region = 77 }
 0x19b   :  { %254 = vsyncpa [#allocation3], 1 }
 0x19c   :  { %256 = vsyncpa [#allocation3 + $0x1], 1 }
 0x19d   :  { %257 = vsyncpa [#allocation4], 1 }
 0x19e   :  { %259 = vsyncpa [#allocation4 + $0x1], 1 }

</bundles_post_ra>
